<compile_context>
chip_gen: v7x
topology: tpu7x:2x2x1
jax: 0.10.0
libtpu: 0.0.40
codegen_flags: <defaults>
</compile_context>

<pallas_src>
import jax
import jax.numpy as jnp
from jax.experimental import pallas as pl
from jax.experimental.pallas import tpu as pltpu

IN_DIM = 28 * 28        # 784
H1 = 256
H2 = 128
OUT_DIM = 10
DEFAULT_BLOCK_B = 2048  # ~18 MiB VMEM at this tile; fits default scoped limit


def _round_up(n, m):
    return ((n + m - 1) // m) * m


def mlp_attacker_kernel(x_ref, w1_ref, b1_ref, w2_ref, b2_ref, w3_ref, b3_ref,
                        o_ref):
    # x tile streamed as f32 (TB, 784); cast to bf16 in-VMEM for the MXU,
    # accumulate in f32. Weights are bf16 and VMEM-resident across the grid.
    x = x_ref[...].astype(jnp.bfloat16)

    h1 = jnp.dot(x, w1_ref[...], preferred_element_type=jnp.float32)     # (TB, 256)
    h1 = jnp.maximum(h1 + b1_ref[...], 0.0)                              # relu(fc1)

    h2 = jnp.dot(h1.astype(jnp.bfloat16), w2_ref[...],
                 preferred_element_type=jnp.float32)                     # (TB, 128)
    h2 = jnp.maximum(h2 + b2_ref[...], 0.0)                              # relu(fc2)

    # Dropout(p=0.3): identity in eval/inference mode.
    # TODO(synk): train-mode dropout mask (pltpu.prng_random_bits) not emitted.

    logits = jnp.dot(h2.astype(jnp.bfloat16), w3_ref[...],
                     preferred_element_type=jnp.float32)                 # (TB, 10)
    logits = logits + b3_ref[...]

    # Numerically stable log_softmax over the 10 real classes.
    m = jnp.max(logits, axis=-1, keepdims=True)
    lse = m + jnp.log(jnp.sum(jnp.exp(logits - m), axis=-1, keepdims=True))
    o_ref[...] = logits - lse


def mlp_attacker_forward(x_img, params, *, block_b=DEFAULT_BLOCK_B):
    """x_img: (B, 1, 28, 28) float32 (NCHW, matching the PyTorch module)."""
    w1, b1, w2, b2, w3, b3 = params
    batch = x_img.shape[0]

    # == x.view(-1, 28*28): free metadata reshape; stays f32, streamed directly.
    x = x_img.reshape(batch, IN_DIM)

    # Batch tile: multiple of 16 (bf16 sublane packing); >=2 grid steps when the
    # batch allows it (v7x has 2 TensorCores sharding the "parallel" axis).
    if batch <= 16:
        tb = batch                      # full-dim block: always a legal block dim
    else:
        tb = max(16, min(block_b, _round_up(pl.cdiv(batch, 2), 16)))
    grid = (pl.cdiv(batch, tb),)        # ragged final block; OOB rows masked

    w1c = w1.astype(jnp.bfloat16)
    w2c = w2.astype(jnp.bfloat16)
    w3c = w3.astype(jnp.bfloat16)
    b1c = b1.astype(jnp.float32)
    b2c = b2.astype(jnp.float32)
    b3c = b3.astype(jnp.float32)

    def resident(shape):
        # Constant index_map => DMA'd once, stays VMEM-resident across the grid.
        return pl.BlockSpec(shape, lambda i: (0, 0))

    cost = pl.CostEstimate(
        flops=2 * batch * (IN_DIM * H1 + H1 * H2 + H2 * OUT_DIM),
        transcendentals=batch * (OUT_DIM + 1),
        bytes_accessed=(batch * (IN_DIM + OUT_DIM) * 4
                        + 2 * (IN_DIM * H1 + H1 * H2 + H2 * OUT_DIM)
                        + 4 * (H1 + H2 + OUT_DIM)),
    )

    out = pl.pallas_call(
        mlp_attacker_kernel,
        out_shape=jax.ShapeDtypeStruct((batch, OUT_DIM), jnp.float32),
        grid=grid,
        in_specs=[
            pl.BlockSpec((tb, IN_DIM), lambda i: (i, 0)),   # streamed f32 x tiles
            resident((IN_DIM, H1)),
            resident((1, H1)),
            resident((H1, H2)),
            resident((1, H2)),
            resident((H2, OUT_DIM)),
            resident((1, OUT_DIM)),
        ],
        out_specs=pl.BlockSpec((tb, OUT_DIM), lambda i: (i, 0)),
        compiler_params=pltpu.CompilerParams(
            dimension_semantics=("parallel",),
        ),
        cost_estimate=cost,
    )(x, w1c, b1c, w2c, b2c, w3c, b3c)

    return out


def init_params(key):
    """Deterministic parameter init (shapes from MLP_Attacker.__init__).

    Weights are stored transposed relative to PyTorch: (in, out)."""
    ks = jax.random.split(key, 6)

    def linear(kw, kb, fan_in, fan_out):
        bound = 1.0 / jnp.sqrt(fan_in)
        w = jax.random.uniform(kw, (fan_in, fan_out), jnp.float32, -bound, bound)
        b = jax.random.uniform(kb, (1, fan_out), jnp.float32, -bound, bound)
        return w, b

    w1, b1 = linear(ks[0], ks[1], IN_DIM, H1)
    w2, b2 = linear(ks[2], ks[3], H1, H2)
    w3, b3 = linear(ks[4], ks[5], H2, OUT_DIM)
    return (w1, b1, w2, b2, w3, b3)


def reference_forward(x_img, params, matmul_dtype=jnp.float32):
    """Pure-JAX reference; matmul_dtype=bfloat16 mimics the kernel's MXU dtype."""
    w1, b1, w2, b2, w3, b3 = params
    x = x_img.reshape(x_img.shape[0], IN_DIM)

    def mm(a, w):
        return jnp.dot(a.astype(matmul_dtype), w.astype(matmul_dtype),
                       preferred_element_type=jnp.float32)

    h1 = jax.nn.relu(mm(x, w1) + b1)
    h2 = jax.nn.relu(mm(h1, w2) + b2)
    logits = mm(h2, w3) + b3
    return jax.nn.log_softmax(logits, axis=1)


if __name__ == "__main__":
    key = jax.random.PRNGKey(0)
    k_param, k_x0, k_x1, k_x2 = jax.random.split(key, 4)

    params = init_params(k_param)

    # Tiny batch: full-dim block path (tb = batch, single grid step).
    x_tiny = jax.random.normal(k_x0, (4, 1, 28, 28), dtype=jnp.float32)
    out_tiny = jax.block_until_ready(mlp_attacker_forward(x_tiny, params))
    ref_tiny = reference_forward(x_tiny, params, matmul_dtype=jnp.bfloat16)
    assert out_tiny.shape == (4, OUT_DIM)
    assert jnp.all(jnp.isfinite(out_tiny))
    assert jnp.allclose(out_tiny, ref_tiny, atol=5e-3, rtol=5e-3)

    # Small batch: exact multi-step grid (B=32 -> tb=16, grid=(2,)).
    x_small = jax.random.normal(k_x1, (32, 1, 28, 28), dtype=jnp.float32)
    out_small = jax.block_until_ready(mlp_attacker_forward(x_small, params))
    ref_small = reference_forward(x_small, params, matmul_dtype=jnp.bfloat16)
    assert out_small.shape == (32, OUT_DIM)
    assert jnp.all(jnp.isfinite(out_small))
    assert jnp.allclose(out_small, ref_small, atol=5e-3, rtol=5e-3)

    # Ragged final block: B=300, tb=128 -> grid=(3,), last block has 44 rows.
    x_big = jax.random.normal(k_x2, (300, 1, 28, 28), dtype=jnp.float32)
    out_big = jax.block_until_ready(
        mlp_attacker_forward(x_big, params, block_b=128))
    ref_big = reference_forward(x_big, params, matmul_dtype=jnp.bfloat16)
    assert out_big.shape == (300, OUT_DIM)
    assert jnp.all(jnp.isfinite(out_big))
    assert jnp.allclose(out_big, ref_big, atol=5e-3, rtol=5e-3)

    print("KERNEL_OK")
</pallas_src>

<mosaic_0001>
module attributes {stable_mosaic.version = 11 : i64} {
  func.func @mlp_attacker_kernel(%arg0: i32, %arg1: memref<4x784xf32, #tpu.memory_space<vmem>>, %arg2: memref<784x256xbf16, #tpu.memory_space<vmem>>, %arg3: memref<1x256xf32, #tpu.memory_space<vmem>>, %arg4: memref<256x128xbf16, #tpu.memory_space<vmem>>, %arg5: memref<1x128xf32, #tpu.memory_space<vmem>>, %arg6: memref<128x10xbf16, #tpu.memory_space<vmem>>, %arg7: memref<1x10xf32, #tpu.memory_space<vmem>>, %arg8: memref<4x10xf32, #tpu.memory_space<vmem>>) attributes {dimension_semantics = [#tpu.dimension_semantics<parallel>], iteration_bounds = array<i64: 1>, scalar_prefetch = 0 : i64, scratch_operands = 0 : i64, tpu.core_type = #tpu.core_type<tc>, window_params = [{transform_indices = @transform_0, window_bounds = array<i64: 4, 784>}, {pipeline_mode = #tpu.pipeline_mode<synchronous>, transform_indices = @transform_1, window_bounds = array<i64: 784, 256>}, {pipeline_mode = #tpu.pipeline_mode<synchronous>, transform_indices = @transform_2, window_bounds = array<i64: 1, 256>}, {pipeline_mode = #tpu.pipeline_mode<synchronous>, transform_indices = @transform_3, window_bounds = array<i64: 256, 128>}, {pipeline_mode = #tpu.pipeline_mode<synchronous>, transform_indices = @transform_4, window_bounds = array<i64: 1, 128>}, {pipeline_mode = #tpu.pipeline_mode<synchronous>, transform_indices = @transform_5, window_bounds = array<i64: 128, 10>}, {pipeline_mode = #tpu.pipeline_mode<synchronous>, transform_indices = @transform_6, window_bounds = array<i64: 1, 10>}, {transform_indices = @transform_7, window_bounds = array<i64: 4, 10>}]} {
    %c0 = arith.constant 0 : index
    %c0_0 = arith.constant 0 : index
    %0 = vector.load %arg1[%c0, %c0_0] : memref<4x784xf32, #tpu.memory_space<vmem>>, vector<4x784xf32>
    %1 = arith.truncf %0 : vector<4x784xf32> to vector<4x784xbf16>
    %c0_1 = arith.constant 0 : index
    %c0_2 = arith.constant 0 : index
    %2 = vector.load %arg2[%c0_1, %c0_2] : memref<784x256xbf16, #tpu.memory_space<vmem>>, vector<784x256xbf16>
    %cst = arith.constant dense<0.000000e+00> : vector<4x256xf32>
    %3 = tpu.matmul %1, %2, %cst {dimension_numbers = #tpu.dot_dimension_numbers<[1], [0], [0], [1], [0, 0, 1, 1], [], []>} : vector<4x784xbf16>, vector<784x256xbf16>, vector<4x256xf32> -> vector<4x256xf32>
    %c0_3 = arith.constant 0 : index
    %c0_4 = arith.constant 0 : index
    %4 = vector.load %arg3[%c0_3, %c0_4] : memref<1x256xf32, #tpu.memory_space<vmem>>, vector<1x256xf32>
    %5 = vector.broadcast %4 : vector<1x256xf32> to vector<4x256xf32>
    %6 = arith.addf %3, %5 : vector<4x256xf32>
    %cst_5 = arith.constant 0.000000e+00 : f32
    %7 = vector.broadcast %cst_5 : f32 to vector<4x256xf32>
    %8 = arith.maximumf %6, %7 : vector<4x256xf32>
    %9 = arith.truncf %8 : vector<4x256xf32> to vector<4x256xbf16>
    %c0_6 = arith.constant 0 : index
    %c0_7 = arith.constant 0 : index
    %10 = vector.load %arg4[%c0_6, %c0_7] : memref<256x128xbf16, #tpu.memory_space<vmem>>, vector<256x128xbf16>
    %cst_8 = arith.constant dense<0.000000e+00> : vector<4x128xf32>
    %11 = tpu.matmul %9, %10, %cst_8 {dimension_numbers = #tpu.dot_dimension_numbers<[1], [0], [0], [1], [0, 0, 1, 1], [], []>} : vector<4x256xbf16>, vector<256x128xbf16>, vector<4x128xf32> -> vector<4x128xf32>
    %c0_9 = arith.constant 0 : index
    %c0_10 = arith.constant 0 : index
    %12 = vector.load %arg5[%c0_9, %c0_10] : memref<1x128xf32, #tpu.memory_space<vmem>>, vector<1x128xf32>
    %13 = vector.broadcast %12 : vector<1x128xf32> to vector<4x128xf32>
    %14 = arith.addf %11, %13 : vector<4x128xf32>
    %cst_11 = arith.constant 0.000000e+00 : f32
    %15 = vector.broadcast %cst_11 : f32 to vector<4x128xf32>
    %16 = arith.maximumf %14, %15 : vector<4x128xf32>
    %17 = arith.truncf %16 : vector<4x128xf32> to vector<4x128xbf16>
    %c0_12 = arith.constant 0 : index
    %c0_13 = arith.constant 0 : index
    %18 = vector.load %arg6[%c0_12, %c0_13] : memref<128x10xbf16, #tpu.memory_space<vmem>>, vector<128x10xbf16>
    %cst_14 = arith.constant dense<0.000000e+00> : vector<4x10xf32>
    %19 = tpu.matmul %17, %18, %cst_14 {dimension_numbers = #tpu.dot_dimension_numbers<[1], [0], [0], [1], [0, 0, 1, 1], [], []>} : vector<4x128xbf16>, vector<128x10xbf16>, vector<4x10xf32> -> vector<4x10xf32>
    %c0_15 = arith.constant 0 : index
    %c0_16 = arith.constant 0 : index
    %20 = vector.load %arg7[%c0_15, %c0_16] : memref<1x10xf32, #tpu.memory_space<vmem>>, vector<1x10xf32>
    %21 = vector.broadcast %20 : vector<1x10xf32> to vector<4x10xf32>
    %22 = arith.addf %19, %21 : vector<4x10xf32>
    %cst_17 = arith.constant dense<0xFF800000> : vector<4xf32>
    %23 = vector.multi_reduction <maximumf>, %22, %cst_17 [1] : vector<4x10xf32> to vector<4xf32>
    %24 = vector.shape_cast %23 : vector<4xf32> to vector<4x1xf32>
    %25 = vector.broadcast %24 : vector<4x1xf32> to vector<4x10xf32>
    %26 = arith.subf %22, %25 : vector<4x10xf32>
    %27 = math.exp %26 : vector<4x10xf32>
    %cst_18 = arith.constant dense<0.000000e+00> : vector<4xf32>
    %28 = vector.multi_reduction <add>, %27, %cst_18 [1] : vector<4x10xf32> to vector<4xf32>
    %29 = vector.shape_cast %28 : vector<4xf32> to vector<4x1xf32>
    %30 = math.log %29 : vector<4x1xf32>
    %31 = arith.addf %24, %30 : vector<4x1xf32>
    %32 = vector.broadcast %31 : vector<4x1xf32> to vector<4x10xf32>
    %33 = arith.subf %22, %32 : vector<4x10xf32>
    %c0_19 = arith.constant 0 : index
    %c0_20 = arith.constant 0 : index
    %34 = vector.load %arg8[%c0_19, %c0_20] : memref<4x10xf32, #tpu.memory_space<vmem>>, vector<4x10xf32>
    tpu.vector_store %arg8[%c0_19, %c0_20], %33 {strides = array<i32>} : memref<4x10xf32, #tpu.memory_space<vmem>>, vector<4x10xf32>,
    return
  }
  func.func @transform_0(%arg0: i32) -> (i32, i32) {
    %c0_i32 = arith.constant 0 : i32
    %c0_i32_0 = arith.constant 0 : i32
    return %arg0, %c0_i32 : i32, i32
  }
  func.func @transform_1(%arg0: i32) -> (i32, i32) {
    %c0_i32 = arith.constant 0 : i32
    %c0_i32_0 = arith.constant 0 : i32
    %c0_i32_1 = arith.constant 0 : i32
    return %c0_i32, %c0_i32_0 : i32, i32
  }
  func.func @transform_2(%arg0: i32) -> (i32, i32) {
    %c0_i32 = arith.constant 0 : i32
    %c0_i32_0 = arith.constant 0 : i32
    %c0_i32_1 = arith.constant 0 : i32
    return %c0_i32, %c0_i32_0 : i32, i32
  }
  func.func @transform_3(%arg0: i32) -> (i32, i32) {
    %c0_i32 = arith.constant 0 : i32
    %c0_i32_0 = arith.constant 0 : i32
    %c0_i32_1 = arith.constant 0 : i32
    return %c0_i32, %c0_i32_0 : i32, i32
  }
  func.func @transform_4(%arg0: i32) -> (i32, i32) {
    %c0_i32 = arith.constant 0 : i32
    %c0_i32_0 = arith.constant 0 : i32
    %c0_i32_1 = arith.constant 0 : i32
    return %c0_i32, %c0_i32_0 : i32, i32
  }
  func.func @transform_5(%arg0: i32) -> (i32, i32) {
    %c0_i32 = arith.constant 0 : i32
    %c0_i32_0 = arith.constant 0 : i32
    %c0_i32_1 = arith.constant 0 : i32
    return %c0_i32, %c0_i32_0 : i32, i32
  }
  func.func @transform_6(%arg0: i32) -> (i32, i32) {
    %c0_i32 = arith.constant 0 : i32
    %c0_i32_0 = arith.constant 0 : i32
    %c0_i32_1 = arith.constant 0 : i32
    return %c0_i32, %c0_i32_0 : i32, i32
  }
  func.func @transform_7(%arg0: i32) -> (i32, i32) {
    %c0_i32 = arith.constant 0 : i32
    %c0_i32_0 = arith.constant 0 : i32
    return %arg0, %c0_i32 : i32, i32
  }
}

</mosaic_0001>

<bundles_post_ra>
// kernel: tpu_custom_call.1
= control target key start
LH: loop header
LB: loop body
LE: loop exit
PB: predicated region body
PF: predicated region fallthrough
CT: control target
= control target key end

     0   :  { %12 = vsyncpa [#allocation3], 0  ;;  %s1761_s0 = inlined_call_operand.vmem [shape: f32[4,784], index: 0, kind: input, shape index: {}]   ;;  %s1762_s1 = inlined_call_operand.hbm [shape: bf16[784,256], index: 1, kind: input, shape index: {}]   ;;  %s1763_s2 = inlined_call_operand.vmem [shape: f32[1,256], index: 2, kind: input, shape index: {}]   ;;  %s1764_s3 = inlined_call_operand.hbm [shape: bf16[256,128], index: 3, kind: input, shape index: {}]   ;;  %s1765_s4 = inlined_call_operand.vmem [shape: f32[1,128], index: 4, kind: input, shape index: {}]   ;;  %s1766_s5 = inlined_call_operand.vmem [shape: bf16[128,10], index: 5, kind: input, shape index: {}]   ;;  %s1767_s6 = inlined_call_operand.vmem [shape: f32[1,10], index: 6, kind: input, shape index: {}]   ;;  %s1768_s7 = inlined_call_operand.hbm [shape: f32[4,10], index: 7, kind: output, shape index: {}]  }
   0x1   :  { %13 = vsyncpa [#allocation6], 0 }
   0x2   :  { %14 = vsyncpa [#allocation4], 0  ;;  %s1615_s24 = smov [#allocation2]   ;;  %s1543_s28 = scalar_lea.hbm %s1762_s1, 12544 }
   0x3   :  { %s22_s25 = sshll.u32 %s1615_s24, 4  ;;  %p1544_p0 = scmp.ne.s32.totalorder %s1762_s1, %s1543_s28  ;;  %s23_s25 = int_to_ptr.vmem [resolvable:$true] %s22_s25 }
   0x4   :  { %p1547_p1 = scmp.lt.u32.totalorder %s1543_s28, %s1762_s1 }
   0x6   :  { %p1549_p2 = pnand %p1547_p1, %p1544_p0 }
   0x8   :  { %1552 = shalt.err (!%p1549_p2)
}
   0x9   :  { %s1553_s10 = scalar_lea.vmem %s23_s25, 12544  ;;  %p1558_p4 = scmp.lt.s32.totalorder %s23_s25, %s23_s25 }
   0xa   :  { %p1554_p3 = scmp.ne.s32.totalorder %s23_s25, %s1553_s10  ;;  %p1559_p5 = scmp.lt.s32.totalorder %s1553_s10, %s1553_s10 }
   0xc   :  { %p1560_p6 = por %p1559_p5, %p1558_p4 }
   0xe   :  { %p1561_p7 = pnand %p1560_p6, %p1554_p3 }
  0x10   :  { %1564 = shalt.err (!%p1561_p7)
}
  0x11   :  { %s1616_s11 = smov 128   ;;  %s1617_s12 = smov 8  }
  0x12   :  { %28 = dma.hbm_to_vmem [thread:$0]  %s1762_s1, 12544, %s23_s25, [#allocation3], %s1616_s11, %s1616_s11, %s1617_s12  }
  0x13   :  { %s1618_s15 = smov [#allocation5]   ;;  %s1565_s19 = scalar_lea.hbm %s1764_s3, 2048 }
  0x14   :  { %s36_s16 = sshll.u32 %s1618_s15, 4  ;;  %p1566_p8 = scmp.ne.s32.totalorder %s1764_s3, %s1565_s19  ;;  %s37_s16 = int_to_ptr.vmem [resolvable:$true] %s36_s16 }
  0x15   :  { %p1569_p9 = scmp.lt.u32.totalorder %s1565_s19, %s1764_s3 }
  0x17   :  { %p1571_p10 = pnand %p1569_p9, %p1566_p8 }
  0x19   :  { %1574 = shalt.err (!%p1571_p10)
}
  0x1a   :  { %s1575_s24 = scalar_lea.vmem %s37_s16, 2048  ;;  %p1580_p12 = scmp.lt.s32.totalorder %s37_s16, %s37_s16 }
  0x1b   :  { %p1576_p11 = scmp.ne.s32.totalorder %s37_s16, %s1575_s24  ;;  %p1581_p13 = scmp.lt.s32.totalorder %s1575_s24, %s1575_s24 }
  0x1d   :  { %p1582_p0 = por %p1581_p13, %p1580_p12 }
  0x1f   :  { %p1583_p1 = pnand %p1582_p0, %p1576_p11 }
  0x21   :  { %1586 = shalt.err (!%p1583_p1)
}
  0x22   :  { %s1619_s1 = smov 64   ;;  %s1620_s25 = smov 4  }
  0x23   :  { %42 = dma.hbm_to_vmem [thread:$0]  %s1764_s3, 2048, %s37_s16, [#allocation6], %s1619_s1, %s1619_s1, %s1620_s25  }
  0x24   :  { %1609 = dma.done.wait [#allocation3], 12544  }
  0x25   :  { %1610 = vsyncadd [#allocation3], 4294954752 }
  0x26   :  { %1611 = dma.done.wait [#allocation6], 2048  }
  0x27   :  { %1612 = vsyncadd [#allocation6], 4294965248  ;;  %v1365_v0 = vld [vmem:[#allocation2 + $0x104] ss:$8 sps:$4 sm:$0xff]   ;;  %v1367_v1 = vld [vmem:[#allocation2 + $0x100] ss:$8 sps:$4 sm:$0xff]  }
  0x28   :  { %721 = vmatprep.subr.bf16.mxu0 %v1365_v0  ;;  %v1368_v2 = vld [vmem:[#allocation2 + $0x114] ss:$8 sps:$4 sm:$0xff]   ;;  %v1370_v3 = vld [vmem:[#allocation2 + $0x110] ss:$8 sps:$4 sm:$0xff]   ;;  %v1371_v4 = vld [vmem:[#allocation2 + $0x124] ss:$8 sps:$4 sm:$0xff]  }
  0x29   :  { %722 = vmatpush1.bf16.msra.mxu0 %v1367_v1  ;;  %v1373_v5 = vld [vmem:[#allocation2 + $0x120] ss:$8 sps:$4 sm:$0xff]   ;;  %v1374_v6 = vld [vmem:[#allocation2 + $0x134] ss:$8 sps:$4 sm:$0xff]   ;;  %v1376_v7 = vld [vmem:[#allocation2 + $0x130] ss:$8 sps:$4 sm:$0xff]  }
  0x2a   :  { %723 = vmatprep.subr.bf16.mxu0 %v1368_v2  ;;  %v1377_v8 = vld [vmem:[#allocation2 + $0x144] ss:$8 sps:$4 sm:$0xff]   ;;  %v1379_v9 = vld [vmem:[#allocation2 + $0x140] ss:$8 sps:$4 sm:$0xff]   ;;  %v1380_v10 = vld [vmem:[#allocation2 + $0x154] ss:$8 sps:$4 sm:$0xff]  }
  0x2b   :  { %v1382_v11 = vld [vmem:[#allocation2 + $0x150] ss:$8 sps:$4 sm:$0xff]   ;;  %v1383_v12 = vld [vmem:[#allocation2 + $0x164] ss:$8 sps:$4 sm:$0xff]   ;;  %v1385_v15 = vld [vmem:[#allocation2 + $0x160] ss:$8 sps:$4 sm:$0xff]  }
  0x2c   :  { %v1692_v13 = vld [vmem:[%s1761_s0 + $0x8] sm:$0xff]  ;;  %v1386_v16 = vld [vmem:[#allocation2 + $0x174] ss:$8 sps:$4 sm:$0xff]   ;;  %v1388_v19 = vld [vmem:[#allocation2 + $0x170] ss:$8 sps:$4 sm:$0xff]   ;;  %vm676_vm0 = vcmask 130048  }
  0x2d   :  { %724 = vmatpush1.bf16.msra.mxu0 %v1370_v3  ;;  %v64_v14 = vcombine.high %v1692_v13, %v1692_v13  ;;  %v1420_v18 = vld [vmem:[#allocation2 + $0x4] ss:$8 sps:$4 sm:$0xff]   ;;  %v1425_v20 = vld [vmem:[#allocation2] ss:$8 sps:$4 sm:$0xff]   ;;  %v1426_v21 = vld [vmem:[#allocation2 + $0x14] ss:$8 sps:$4 sm:$0xff]   ;;  %v71_v58 = vpack.c.bf16 %v1692_v13, %v1692_v13 }
  0x2e   :  { %725 = vmatprep.subr.bf16.mxu0 %v1371_v4  ;;  %680 = vmatprep.subr.bf16.mxu1 %v1420_v18  ;;  %v1389_v22 = vld [vmem:[#allocation2 + $0x184] ss:$8 sps:$4 sm:$0xff]   ;;  %v1431_v23 = vld [vmem:[#allocation2 + $0x10] ss:$8 sps:$4 sm:$0xff]   ;;  %v1391_v25 = vld [vmem:[#allocation2 + $0x180] ss:$8 sps:$4 sm:$0xff]  }
  0x2f   :  { %v72_v17 = vpack.c.bf16 %v64_v14, %v64_v14  ;;  %681 = vmatpush1.bf16.msra.mxu1 %v1425_v20  ;;  %v1432_v24 = vld [vmem:[#allocation2 + $0x24] ss:$8 sps:$4 sm:$0xff]   ;;  %v1392_v26 = vld [vmem:[#allocation2 + $0x194] ss:$8 sps:$4 sm:$0xff]   ;;  %v1437_v27 = vld [vmem:[#allocation2 + $0x20] ss:$8 sps:$4 sm:$0xff]  }
  0x30   :  { %682 = vmatprep.subr.bf16.mxu1 %v1426_v21  ;;  %v1438_v28 = vld [vmem:[#allocation2 + $0x34] ss:$8 sps:$4 sm:$0xff]   ;;  %v1394_v29 = vld [vmem:[#allocation2 + $0x190] ss:$8 sps:$4 sm:$0xff]   ;;  %v1395_v30 = vld [vmem:[#allocation2 + $0x1a4] ss:$8 sps:$4 sm:$0xff]  }
  0x31   :  { %726 = vmatpush1.bf16.msra.mxu0 %v1373_v5  ;;  %753 = vmatprep.mubr.bf16.mxu0 %v72_v17  ;;  %v1443_v31 = vld [vmem:[#allocation2 + $0x30] ss:$8 sps:$4 sm:$0xff]   ;;  %v1444_v32 = vld [vmem:[#allocation2 + $0x44] ss:$8 sps:$4 sm:$0xff]   ;;  %v1397_v33 = vld [vmem:[#allocation2 + $0x1a0] ss:$8 sps:$4 sm:$0xff]  }
  0x32   :  { %727 = vmatprep.subr.bf16.mxu0 %v1374_v6  ;;  %v1398_v34 = vld [vmem:[#allocation2 + $0x1b4] ss:$8 sps:$4 sm:$0xff]   ;;  %v1449_v35 = vld [vmem:[#allocation2 + $0x40] ss:$8 sps:$4 sm:$0xff]   ;;  %v1400_v37 = vld [vmem:[#allocation2 + $0x1b0] ss:$8 sps:$4 sm:$0xff]  }
  0x33   :  { %683 = vmatpush1.bf16.msra.mxu1 %v1431_v23  ;;  %v1450_v36 = vld [vmem:[#allocation2 + $0x54] ss:$8 sps:$4 sm:$0xff]   ;;  %v1401_v38 = vld [vmem:[#allocation2 + $0x1c4] ss:$8 sps:$4 sm:$0xff]   ;;  %v1455_v39 = vld [vmem:[#allocation2 + $0x50] ss:$8 sps:$4 sm:$0xff]  }
  0x34   :  { %684 = vmatprep.subr.bf16.mxu1 %v1432_v24  ;;  %v1456_v40 = vld [vmem:[#allocation2 + $0x64] ss:$8 sps:$4 sm:$0xff]   ;;  %v1403_v41 = vld [vmem:[#allocation2 + $0x1c0] ss:$8 sps:$4 sm:$0xff]   ;;  %v1404_v42 = vld [vmem:[#allocation2 + $0x1d4] ss:$8 sps:$4 sm:$0xff]  }
  0x35   :  { %728 = vmatpush1.bf16.msra.mxu0 %v1376_v7  ;;  %v1461_v43 = vld [vmem:[#allocation2 + $0x60] ss:$8 sps:$4 sm:$0xff]   ;;  %v1462_v44 = vld [vmem:[#allocation2 + $0x74] ss:$8 sps:$4 sm:$0xff]   ;;  %v1406_v45 = vld [vmem:[#allocation2 + $0x1d0] ss:$8 sps:$4 sm:$0xff]  }
  0x36   :  { %729 = vmatprep.subr.bf16.mxu0 %v1377_v8  ;;  %v1407_v46 = vld [vmem:[#allocation2 + $0x1e4] ss:$8 sps:$4 sm:$0xff]   ;;  %v1467_v47 = vld [vmem:[#allocation2 + $0x70] ss:$8 sps:$4 sm:$0xff]   ;;  %v1409_v49 = vld [vmem:[#allocation2 + $0x1e0] ss:$8 sps:$4 sm:$0xff]  }
  0x37   :  { %685 = vmatpush1.bf16.msra.mxu1 %v1437_v27  ;;  %v1468_v48 = vld [vmem:[#allocation2 + $0x84] ss:$8 sps:$4 sm:$0xff]   ;;  %v1410_v50 = vld [vmem:[#allocation2 + $0x1f4] ss:$8 sps:$4 sm:$0xff]   ;;  %v1473_v51 = vld [vmem:[#allocation2 + $0x80] ss:$8 sps:$4 sm:$0xff]  }
  0x38   :  { %686 = vmatprep.subr.bf16.mxu1 %v1438_v28  ;;  %v1474_v52 = vld [vmem:[#allocation2 + $0x94] ss:$8 sps:$4 sm:$0xff]   ;;  %v1412_v53 = vld [vmem:[#allocation2 + $0x1f0] ss:$8 sps:$4 sm:$0xff]   ;;  %v1416_v54 = vld [vmem:[#allocation2 + $0x204] ss:$8 sps:$4 sm:$0xff]  }
  0x39   :  { %730 = vmatpush1.bf16.msra.mxu0 %v1379_v9  ;;  %v1479_v55 = vld [vmem:[#allocation2 + $0x90] ss:$8 sps:$4 sm:$0xff]   ;;  %v1480_v56 = vld [vmem:[#allocation2 + $0xa4] ss:$8 sps:$4 sm:$0xff]   ;;  %v1414_v60 = vld [vmem:[#allocation2 + $0x200] ss:$8 sps:$4 sm:$0xff]  }
  0x3a   :  { %731 = vmatprep.subr.bf16.mxu0 %v1380_v10  ;;  %v1699_v57 = vld [vmem:[%s1761_s0 + $0x10] sm:$0xff]  ;;  %v1485_v62 = vld [vmem:[#allocation2 + $0xa0] ss:$8 sps:$4 sm:$0xff]   ;;  %v1424_v3 = vld [vmem:[#allocation2 + $0x224] ss:$8 sps:$4 sm:$0xff]   ;;  %vm1623_vm1 = vmmov 0  }
  0x3b   :  { %687 = vmatpush1.bf16.msra.mxu1 %v1443_v31  ;;  %v65_v59 = vcombine.high %v1699_v57, %v1699_v57  ;;  %v1419_v61 = vld [vmem:[#allocation2 + $0x214] ss:$8 sps:$4 sm:$0xff]   ;;  %v1417_v1 = vld [vmem:[#allocation2 + $0x210] ss:$8 sps:$4 sm:$0xff]   ;;  %v56_v2 = vld [vmem:[%s1761_s0] sm:$0xff]  ;;  %vm1136_vm2 = vcmask 76800  }
  0x3c   :  { %688 = vmatprep.subr.bf16.mxu1 %v1444_v32  ;;  %v1486_v0 = vld [vmem:[#allocation2 + $0xb4] ss:$8 sps:$4 sm:$0xff]   ;;  %v63_v4 = vcombine.high %v56_v2, %v56_v2  ;;  %v1491_v5 = vld [vmem:[#allocation2 + $0xb0] ss:$8 sps:$4 sm:$0xff]   ;;  %v1492_v6 = vld [vmem:[#allocation2 + $0xc4] ss:$8 sps:$4 sm:$0xff]  }
  0x3d   :  { %732 = vmatpush1.bf16.msra.mxu0 %v1382_v11  ;;  %v74_v63 = vpack.c.bf16 %v65_v59, %v65_v59  ;;  %v1422_v8 = vld [vmem:[#allocation2 + $0x220] ss:$8 sps:$4 sm:$0xff]   ;;  %v1430_v9 = vld [vmem:[#allocation2 + $0x234] ss:$8 sps:$4 sm:$0xff]   ;;  %v1436_v13 = vld [vmem:[#allocation2 + $0x244] ss:$8 sps:$4 sm:$0xff]  }
  0x3e   :  { %733 = vmatprep.subr.bf16.mxu0 %v1383_v12  ;;  %v70_v7 = vpack.c.bf16 %v63_v4, %v63_v4  ;;  %v1497_v10 = vld [vmem:[#allocation2 + $0xc0] ss:$8 sps:$4 sm:$0xff]   ;;  %v1498_v11 = vld [vmem:[#allocation2 + $0xd4] ss:$8 sps:$4 sm:$0xff]   ;;  %v1428_v12 = vld [vmem:[#allocation2 + $0x230] ss:$8 sps:$4 sm:$0xff]  }
  0x3f   :  { %689 = vmatpush1.bf16.msra.mxu1 %v1449_v35  ;;  %v1503_v14 = vld [vmem:[#allocation2 + $0xd0] ss:$8 sps:$4 sm:$0xff]   ;;  %v1442_v17 = vld [vmem:[#allocation2 + $0x254] ss:$8 sps:$4 sm:$0xff]   ;;  %v1510_v18 = vld [vmem:[#allocation2 + $0xe0] ss:$8 sps:$4 sm:$0xff]  }
  0x40   :  { %690 = vmatprep.subr.bf16.mxu1 %v1450_v36  ;;  %712 = vmatprep.mubr.bf16.mxu1 %v70_v7  ;;  %v1440_v20 = vld [vmem:[#allocation2 + $0x250] ss:$8 sps:$4 sm:$0xff]   ;;  %v1448_v21 = vld [vmem:[#allocation2 + $0x264] ss:$8 sps:$4 sm:$0xff]   ;;  %v1446_v24 = vld [vmem:[#allocation2 + $0x260] ss:$8 sps:$4 sm:$0xff]  }
  0x41   :  { %734 = vmatpush1.bf16.msra.mxu0 %v1385_v15  ;;  %v1505_v15 = vld [vmem:[#allocation2 + $0xe4] ss:$8 sps:$4 sm:$0xff]   ;;  %v1515_v23 = vld [vmem:[#allocation5 + $0x40] sm:$0xff]   ;;  %v1517_v28 = vld [vmem:[#allocation5 + $0x48] sm:$0xff]  }
  0x42   :  { %735 = vmatprep.subr.bf16.mxu0 %v1386_v16  ;;  %v1434_v16 = vld [vmem:[#allocation2 + $0x240] ss:$8 sps:$4 sm:$0xff]   ;;  %v1516_v27 = vld [vmem:[#allocation5] sm:$0xff]   ;;  %v1518_v31 = vld [vmem:[#allocation5 + $0x8] sm:$0xff]  }
  0x43   :  { %691 = vmatpush1.bf16.msra.mxu1 %v1455_v39  ;;  %v1519_v32 = vld [vmem:[#allocation5 + $0x50] sm:$0xff]   ;;  %v1521_v36 = vld [vmem:[#allocation5 + $0x58] sm:$0xff]  }
  0x44   :  { %692 = vmatprep.subr.bf16.mxu1 %v1456_v40  ;;  %v1520_v35 = vld [vmem:[#allocation5 + $0x10] sm:$0xff]   ;;  %v1522_v39 = vld [vmem:[#allocation5 + $0x18] sm:$0xff]   ;;  %v1523_v40 = vld [vmem:[#allocation5 + $0x60] sm:$0xff]  }
  0x45   :  { %736 = vmatpush1.bf16.msra.mxu0 %v1388_v19  ;;  %v1511_v19 = vld [vmem:[#allocation2 + $0xf4] ss:$8 sps:$4 sm:$0xff]  }
  0x46   :  { %737 = vmatprep.subr.bf16.mxu0 %v1389_v22  ;;  %v1513_v22 = vld [vmem:[#allocation2 + $0xf0] ss:$8 sps:$4 sm:$0xff]  }
  0x47   :  { %693 = vmatpush1.bf16.msra.mxu1 %v1461_v43  ;;  %v1524_v43 = vld [vmem:[#allocation5 + $0x20] sm:$0xff]  }
  0x48   :  { %694 = vmatprep.subr.bf16.mxu1 %v1462_v44  ;;  %v1476_v44 = vld [vmem:[#allocation2 + $0x2b0] ss:$8 sps:$4 sm:$0xff]  }
  0x49   :  { %738 = vmatpush1.bf16.msra.mxu0 %v1391_v25  ;;  %v69_v25 = vpack.c.bf16 %v56_v2, %v56_v2 }
  0x4a   :  { %739 = vmatprep.subr.bf16.mxu0 %v1392_v26  ;;  %v1454_v26 = vld [vmem:[#allocation2 + $0x274] ss:$8 sps:$4 sm:$0xff]  }
  0x4b   :  { %695 = vmatpush1.bf16.msra.mxu1 %v1467_v47  ;;  %v1490_v47 = vld [vmem:[#allocation2 + $0x2d4] ss:$8 sps:$4 sm:$0xff]  }
  0x4c   :  { %696 = vmatprep.subr.bf16.mxu1 %v1468_v48  ;;  %v1488_v48 = vld [vmem:[#allocation2 + $0x2d0] ss:$8 sps:$4 sm:$0xff]  }
  0x4d   :  { %740 = vmatpush1.bf16.msra.mxu0 %v1394_v29  ;;  %v1452_v29 = vld [vmem:[#allocation2 + $0x270] ss:$8 sps:$4 sm:$0xff]  }
  0x4e   :  { %741 = vmatprep.subr.bf16.mxu0 %v1395_v30  ;;  %v1460_v30 = vld [vmem:[#allocation2 + $0x284] ss:$8 sps:$4 sm:$0xff]  }
  0x4f   :  { %697 = vmatpush1.bf16.msra.mxu1 %v1473_v51  ;;  %v1502_v51 = vld [vmem:[#allocation2 + $0x2f4] ss:$8 sps:$4 sm:$0xff]  }
  0x50   :  { %698 = vmatprep.subr.bf16.mxu1 %v1474_v52  ;;  %v1500_v52 = vld [vmem:[#allocation2 + $0x2f0] ss:$8 sps:$4 sm:$0xff]  }
  0x51   :  { %742 = vmatpush1.bf16.msra.mxu0 %v1397_v33  ;;  %v1458_v33 = vld [vmem:[#allocation2 + $0x280] ss:$8 sps:$4 sm:$0xff]  }
  0x52   :  { %743 = vmatprep.subr.bf16.mxu0 %v1398_v34  ;;  %v1466_v34 = vld [vmem:[#allocation2 + $0x294] ss:$8 sps:$4 sm:$0xff]  }
  0x53   :  { %699 = vmatpush1.bf16.msra.mxu1 %v1479_v55  ;;  %v1507_v55 = vld [vmem:[#allocation2 + $0x300] ss:$8 sps:$4 sm:$0xff]  }
  0x54   :  { %700 = vmatprep.subr.bf16.mxu1 %v1480_v56  ;;  %v1621_v56 = vmov 0  }
  0x55   :  { %744 = vmatpush1.bf16.msra.mxu0 %v1400_v37  ;;  %v1464_v37 = vld [vmem:[#allocation2 + $0x290] ss:$8 sps:$4 sm:$0xff]  }
  0x56   :  { %745 = vmatprep.subr.bf16.mxu0 %v1401_v38  ;;  %v1472_v38 = vld [vmem:[#allocation2 + $0x2a4] ss:$8 sps:$4 sm:$0xff]  }
  0x57   :  { %701 = vmatpush1.bf16.msra.mxu1 %v1485_v62  ;;  %v1527_v62 = vld [vmem:[#allocation5 + $0x70] sm:$0xff]  }
  0x58   :  { %702 = vmatprep.subr.bf16.mxu1 %v1486_v0  ;;  %v1530_v0 = vld [vmem:[#allocation5 + $0x38] sm:$0xff]  }
  0x59   :  { %746 = vmatpush1.bf16.msra.mxu0 %v1403_v41  ;;  %v1470_v41 = vld [vmem:[#allocation2 + $0x2a0] ss:$8 sps:$4 sm:$0xff]  }
  0x5a   :  { %747 = vmatprep.subr.bf16.mxu0 %v1404_v42  ;;  %v1478_v42 = vld [vmem:[#allocation2 + $0x2b4] ss:$8 sps:$4 sm:$0xff]  }
  0x5b   :  { %703 = vmatpush1.bf16.msra.mxu1 %v1491_v5 }
  0x5c   :  { %704 = vmatprep.subr.bf16.mxu1 %v1492_v6  ;;  %v176_v6 = vlaneseq }
  0x5d   :  { %748 = vmatpush1.bf16.msra.mxu0 %v1406_v45  ;;  %v1484_v45 = vld [vmem:[#allocation2 + $0x2c4] ss:$8 sps:$4 sm:$0xff]  }
  0x5e   :  { %749 = vmatprep.subr.bf16.mxu0 %v1407_v46  ;;  %v1482_v46 = vld [vmem:[#allocation2 + $0x2c0] ss:$8 sps:$4 sm:$0xff]   ;;  %v177_v7 = vshrl.u32 %v176_v6, 7 }
  0x5f   :  { %705 = vmatpush1.bf16.msra.mxu1 %v1497_v10 }
  0x60   :  { %706 = vmatprep.subr.bf16.mxu1 %v1498_v11  ;;  %v182_v10 = vsub.s32 1, %v177_v7 }
  0x61   :  { %750 = vmatpush1.bf16.msra.mxu0 %v1409_v49  ;;  %v1496_v49 = vld [vmem:[#allocation2 + $0x2e4] ss:$8 sps:$4 sm:$0xff]  }
  0x62   :  { %751 = vmatprep.subr.bf16.mxu0 %v1410_v50  ;;  %v1494_v50 = vld [vmem:[#allocation2 + $0x2e0] ss:$8 sps:$4 sm:$0xff]  }
  0x63   :  { %707 = vmatpush1.bf16.msra.mxu1 %v1503_v14 }
  0x64   :  { %708 = vmatprep.subr.bf16.mxu1 %v1505_v15 }
  0x65   :  { %752 = vmatpush1.bf16.msra.mxu0 %v1412_v53  ;;  %v1509_v53 = vld [vmem:[#allocation2 + $0x304] ss:$8 sps:$4 sm:$0xff]  }
  0x66   :  { %762 = vmatprep.subr.bf16.mxu0 %v1416_v54  ;;  %v73_v54 = vpack.c.bf16 %v1699_v57, %v1699_v57  ;;  %v1528_v57 = vld [vmem:[#allocation5 + $0x30] sm:$0xff]  }
  0x67   :  { %709 = vmatpush1.bf16.msra.mxu1 %v1510_v18 }
  0x68   :  { %754 = vmatmul.mubr.bf16.vlgmr.msra.gmra.mrb[0].mxu0 %v71_v58  ;;  %710 = vmatprep.subr.bf16.mxu1 %v1511_v19  ;;  %v59_v58 = vld [vmem:[%s1761_s0 + $0x18] sm:$0xf] }
  0x69   :  { %763 = vmatpush1.bf16.msra.mxu0 %v1414_v60  ;;  %794 = vmatprep.mubr.bf16.mxu0 %v74_v63  ;;  %v75_v59 = vpack.c.bf16 %v59_v58, %v59_v58  ;;  %v1525_v60 = vld [vmem:[#allocation5 + $0x68] sm:$0xff]   ;;  %v1529_v63 = vld [vmem:[#allocation5 + $0x78] sm:$0xff]  }
  0x6a   :  { %764 = vmatprep.subr.bf16.mxu0 %v1419_v61  ;;  %v1526_v61 = vld [vmem:[#allocation5 + $0x28] sm:$0xff]  }
  0x6b   :  { %711 = vmatpush1.bf16.msra.mxu1 %v1513_v22 }
  0x6c   :  { %1292 = vmatprep.subr.bf16.mxu1 %v1515_v23 }
  0x6d   :  { %765 = vmatpush1.bf16.msra.mxu0 %v1417_v1  ;;  %v1622_v1 = vmov 0.0  }
  0x6e   :  { %766 = vmatprep.subr.bf16.mxu0 %v1424_v3  ;;  %713 = vmatmul.mubr.bf16.vlgmr.msra.gmra.mrb[0].mxu1 %v69_v25 }
  0x6f   :  { %1293 = vmatpush3.bf16.msra.mxu1 %v1516_v27  ;;  %v1533_v27 = vld [vmem:[%s1766_s5 + $0x10] sm:$0xff]  }
  0x70   :  { %1294 = vmatprep.subr.bf16.mxu1 %v1517_v28  ;;  %v1534_v28 = vld [vmem:[%s1766_s5 + $0x18] sm:$0xff]  }
  0x71   :  { %767 = vmatpush1.bf16.msra.mxu0 %v1422_v8  ;;  %v178_v8 = vsub.s32 0, %v177_v7 }
  0x72   :  { %768 = vmatprep.subr.bf16.mxu0 %v1430_v9  ;;  %v174_v9 = vld [vmem:[%s1763_s2] sm:$0x3] }
  0x73   :  { %1295 = vmatpush3.bf16.msra.mxu1 %v1518_v31  ;;  %v179_v11 = vrot.slane %v174_v9, %v178_v8  ;;  %v1537_v31 = vld [vmem:[%s1766_s5 + $0x30] sm:$0xff]  }
  0x74   :  { %1296 = vmatprep.subr.bf16.mxu1 %v1519_v32  ;;  %v1538_v32 = vld [vmem:[%s1766_s5 + $0x38] sm:$0xff]  }
  0x75   :  { %769 = vmatpush1.bf16.msra.mxu0 %v1428_v12  ;;  %v183_v12 = vrot.slane %v174_v9, %v182_v10 }
  0x76   :  { %770 = vmatprep.subr.bf16.mxu0 %v1436_v13 }
  0x77   :  { %1297 = vmatpush3.bf16.msra.mxu1 %v1520_v35 }
  0x78   :  { %1298 = vmatprep.subr.bf16.mxu1 %v1521_v36 }
  0x79   :  { %771 = vmatpush1.bf16.msra.mxu0 %v1434_v16 }
  0x7a   :  { %772 = vmatprep.subr.bf16.mxu0 %v1442_v17 }
  0x7b   :  { %1299 = vmatpush3.bf16.msra.mxu1 %v1522_v39 }
  0x7c   :  { %1300 = vmatprep.subr.bf16.mxu1 %v1523_v40 }
  0x7d   :  { %773 = vmatpush1.bf16.msra.mxu0 %v1440_v20 }
  0x7e   :  { %774 = vmatprep.subr.bf16.mxu0 %v1448_v21 }
  0x7f   :  { %1301 = vmatpush3.bf16.msra.mxu1 %v1524_v43 }
  0x80   :  { %1302 = vmatprep.subr.bf16.mxu1 %v1525_v60 }
  0x81   :  { %775 = vmatpush1.bf16.msra.mxu0 %v1446_v24  ;;  %v1531_v24 = vld [vmem:[%s1766_s5] sm:$0xff]  }
  0x82   :  { %776 = vmatprep.subr.bf16.mxu0 %v1454_v26  ;;  %v1532_v26 = vld [vmem:[%s1766_s5 + $0x8] sm:$0xff]  }
  0x83   :  { %1303 = vmatpush3.bf16.msra.mxu1 %v1526_v61 }
  0x84   :  { %1304 = vmatprep.subr.bf16.mxu1 %v1527_v62 }
  0x85   :  { %777 = vmatpush1.bf16.msra.mxu0 %v1452_v29  ;;  %v1535_v29 = vld [vmem:[%s1766_s5 + $0x20] sm:$0xff]  }
  0x86   :  { %778 = vmatprep.subr.bf16.mxu0 %v1460_v30  ;;  %v1536_v30 = vld [vmem:[%s1766_s5 + $0x28] sm:$0xff]  }
  0x87   :  { %1305 = vmatpush3.bf16.msra.mxu1 %v1528_v57 }
  0x88   :  { %1306 = vmatprep.subr.bf16.mxu1 %v1529_v63 }
  0x89   :  { %779 = vmatpush1.bf16.msra.mxu0 %v1458_v33 }
  0x8a   :  { %780 = vmatprep.subr.bf16.mxu0 %v1466_v34  ;;  %v1266_v34 = vld [vmem:[%s1765_s4] ss:$0 sm:$0xff]  ;;  %s1624_s4 = smov [#allocation7]  }
  0x8b   :  { %1307 = vmatpush3.bf16.msra.mxu1 %v1530_v0  ;;  %s1157_s5 = sshll.u32 %s1624_s4, 4  ;;  %s1158_s5 = int_to_ptr.vmem [resolvable:$true] %s1157_s5 }
  0x8c   :  { %1323 = vmatprep.subr.bf16.mxu1 %v1622_v1  ;;  %p1592_p3 = scmp.lt.s32.totalorder %s1158_s5, %s1158_s5 }
  0x8d   :  { %781 = vmatpush1.bf16.msra.mxu0 %v1464_v37 }
  0x8e   :  { %782 = vmatprep.subr.bf16.mxu0 %v1472_v38 }
  0x91   :  { %783 = vmatpush1.bf16.msra.mxu0 %v1470_v41 }
  0x92   :  { %784 = vmatprep.subr.bf16.mxu0 %v1478_v42  ;;  %v1283_v42 = vld [vmem:[%s1767_s6] ss:$0 sm:$0xff]  ;;  %s1587_s6 = scalar_lea.vmem %s1158_s5, 64 }
  0x93   :  { %p1588_p2 = scmp.ne.s32.totalorder %s1158_s5, %s1587_s6  ;;  %p1593_p4 = scmp.lt.s32.totalorder %s1587_s6, %s1587_s6 }
  0x95   :  { %785 = vmatpush1.bf16.msra.mxu0 %v1476_v44  ;;  %p1594_p5 = por %p1593_p4, %p1592_p3 }
  0x96   :  { %786 = vmatprep.subr.bf16.mxu0 %v1484_v45 }
  0x97   :  { %p1595_p6 = pnand %p1594_p5, %p1588_p2 }
  0x99   :  { %787 = vmatpush1.bf16.msra.mxu0 %v1482_v46 }
  0x9a   :  { %788 = vmatprep.subr.bf16.mxu0 %v1490_v47 }
  0x9d   :  { %789 = vmatpush1.bf16.msra.mxu0 %v1488_v48 }
  0x9e   :  { %790 = vmatprep.subr.bf16.mxu0 %v1496_v49 }
  0xa1   :  { %791 = vmatpush1.bf16.msra.mxu0 %v1494_v50 }
  0xa2   :  { %792 = vmatprep.subr.bf16.mxu0 %v1502_v51 }
  0xa5   :  { %793 = vmatpush1.bf16.msra.mxu0 %v1500_v52 }
  0xa6   :  { %803 = vmatprep.subr.bf16.mxu0 %v1509_v53 }
  0xa8   :  { %795 = vmatmul.mubr.bf16.vlgmr.msra.gmra.mrb[0].mxu0 %v73_v54 }
  0xa9   :  { %804 = vmatpush1.bf16.msra.mxu0 %v1507_v55  ;;  %835 = vmatprep.mubr.bf16.mxu0 %v1621_v56 }
  0xb4   :  { %1265 = vmatmul.mubr.msk.bf16.vlgmr.msra.gmra.mrb[0].mxu0 %vm676_vm0, %v75_v59 }
 0x141   :  { %v714_v2 = vpop.f32.mrb[0].mxu1 }
 0x142   :  { %v716_v3 = vpop.f32.mrb[1].mxu1  ;;  %v715_v13 = vadd.f32 %v714_v2, %v179_v11 }
 0x143   :  { %v718_v4 = vpop.f32.mrb[2].mxu1  ;;  %v717_v14 = vadd.f32 %v716_v3, %v183_v12 }
 0x144   :  { %v719_v5 = vpop.f32.mrb[3].mxu1 }
 0x187   :  { %v837_v15 = vpop.f32.mrb[0].mxu0 }
 0x188   :  { %v1344_v16 = vadd.f32 %v837_v15, %v715_v13  ;;  %v839_v17 = vpop.f32.mrb[1].mxu0 }
 0x189   :  { %v1346_v18 = vadd.f32 %v839_v17, %v717_v14  ;;  %v841_v19 = vpop.f32.mrb[2].mxu0 }
 0x18a   :  { %v844_v20 = vmax.f32 %v1344_v16, 0.0  ;;  %v842_v21 = vpop.f32.mrb[3].mxu0 }
 0x18b   :  { %v845_v22 = vmax.f32 %v1346_v18, 0.0 }
 0x18c   :  { %v846_v25 = vpack.c.bf16 %v844_v20, %v844_v20 }
 0x18d   :  { %v847_v23 = vpack.c.bf16 %v845_v22, %v845_v22 }
 0x18f   :  { %1015 = vmatprep.mubr.bf16.mxu1 %v847_v23 }
 0x190   :  { %1016 = vmatmul.mubr.bf16.vlgmr.msra.gmra.mrb[4].mxu1 %v846_v25 }
 0x191   :  { %1324 = vmatpush3.bf16.msra.mxu1 %v1531_v24  ;;  %1339 = vmatprep.mubr.msk.bf16.mxu1 %vm1623_vm1, %v1622_v1 }
 0x192   :  { %1325 = vmatprep.subr.bf16.mxu1 %v1622_v1 }
 0x195   :  { %1326 = vmatpush3.bf16.msra.mxu1 %v1532_v26 }
 0x196   :  { %1327 = vmatprep.subr.bf16.mxu1 %v1622_v1 }
 0x199   :  { %1328 = vmatpush3.bf16.msra.mxu1 %v1533_v27 }
 0x19a   :  { %1329 = vmatprep.subr.bf16.mxu1 %v1622_v1 }
 0x19d   :  { %1330 = vmatpush3.bf16.msra.mxu1 %v1534_v28 }
 0x19e   :  { %1331 = vmatprep.subr.bf16.mxu1 %v1622_v1 }
 0x1a1   :  { %1332 = vmatpush3.bf16.msra.mxu1 %v1535_v29 }
 0x1a2   :  { %1333 = vmatprep.subr.bf16.mxu1 %v1622_v1 }
 0x1a5   :  { %1334 = vmatpush3.bf16.msra.mxu1 %v1536_v30 }
 0x1a6   :  { %1335 = vmatprep.subr.bf16.mxu1 %v1622_v1 }
 0x1a9   :  { %1336 = vmatpush3.bf16.msra.mxu1 %v1537_v31 }
 0x1aa   :  { %1337 = vmatprep.subr.bf16.mxu1 %v1622_v1 }
 0x1ad   :  { %1338 = vmatpush3.bf16.msra.mxu1 %v1538_v32 }
 0x263   :  { %v1308_v33 = vpop.f32.mrb[4].mxu1 }
 0x264   :  { %v1309_v35 = vpop.f32.mrb[5].mxu1 }
 0x265   :  { %v1310_v36 = vadd.f32 %v1309_v35, %v1308_v33  ;;  %v1311_v37 = vpop.f32.mrb[6].mxu1 }
 0x266   :  { %v1312_v38 = vpop.f32.mrb[7].mxu1 }
 0x267   :  { %v1018_v39 = vadd.f32 %v1310_v36, %v1266_v34 }
 0x269   :  { %v1023_v40 = vmax.f32 %v1018_v39, 0.0 }
 0x26b   :  { %v1024_v41 = vpack.c.bf16 %v1023_v40, %v1023_v40 }
 0x26d   :  { %1340 = vmatmul.mubr.bf16.vlgmr.msra.gmra.mrb[8].mxu1 %v1024_v41 }
 0x340   :  { %v1130_v43 = vpop.f32.mrb[8].mxu1 }
 0x341   :  { %v1131_v44 = vadd.f32 %v1283_v42, %v1130_v43  ;;  %v1341_v45 = vpop.f32.mrb[9].mxu1 }
 0x342   :  { %v1133_v46 = vpop.f32.mrb[10].mxu1 }
 0x343   :  { %v1342_v47 = vpop.f32.mrb[11].mxu1  ;;  %v1137_v48 = vsel %vm1136_vm2, %v1131_v44, -inf }
 0x344   :  { %1138 = vmax.xlane.f32.xlu0 %v1137_v48 }
 0x3d1   :  { %v1139_v49 = vpop.xlane.xlu0 %1138 }
 0x3d2   :  { %v1140_v50 = vsub.f32 %v1131_v44, %v1139_v49 }
 0x3d4   :  { %v1141_v51 = vmul.f32 1.442695, %v1140_v50 }
 0x3d6   :  { %1539 = vpow2.f32 %v1141_v51 }
 0x3e0   :  { %v1540_v52 = vpop.eup %1539 }
 0x3e1   :  { %v1143_v53 = vsel %vm1136_vm2, %v1540_v52, 0.0 }
 0x3e2   :  { %1144 = vadd.xlane.f32.xlu0 %v1143_v53 }
 0x46f   :  { %v1145_v54 = vpop.xlane.xlu0 %1144 }
 0x470   :  { %1541 = vlog2.f32 %v1145_v54 }
 0x47a   :  { %v1542_v55 = vpop.eup %1541 }
 0x47b   :  { %v1147_v56 = vmul.f32 0.6931472, %v1542_v55 }
 0x47d   :  { %v1148_v58 = vadd.f32 %v1147_v56, %v1139_v49 }
 0x47f   :  { %v1149_v59 = vsub.f32 %v1131_v44, %v1148_v58 }
 0x481   :  { %1150 = vst.msk [vmem:[#allocation7] sm:$0xf] %vm1136_vm2, %v1149_v59 }
 0x482   :  { %1598 = shalt.err (!%p1595_p6)
}
 0x483   :  { %s1599_s9 = scalar_lea.hbm %s1768_s7, 64 }
 0x484   :  { %p1600_p7 = scmp.ne.s32.totalorder %s1768_s7, %s1599_s9  ;;  %p1603_p8 = scmp.lt.u32.totalorder %s1599_s9, %s1768_s7 }
 0x486   :  { %p1605_p9 = pnand %p1603_p8, %p1600_p7 }
 0x488   :  { %1608 = shalt.err (!%p1605_p9)
}
 0x489   :  { %1160 = dma.vmem_to_hbm [thread:$0]  %s1158_s5, 64, %s1768_s7, [#allocation4]  }
 0x48a   :  { %1613 = dma.done.wait [#allocation4], 64  }
 0x48b   :  { %1614 = vsyncadd [#allocation4], 4294967232 }
 0x48c   :  { %1164 = vsyncpa [#allocation3], 1 }
 0x48d   :  { %1165 = vsyncpa [#allocation6], 1 }
 0x48e   :  { %1166 = vsyncpa [#allocation4], 1 }

</bundles_post_ra>
